<compile_context>
chip_gen: v6e
topology: v6e:2x2x1
jax: 0.10.0
libtpu: 0.0.40
codegen_flags: <defaults>
</compile_context>

<pallas_src>
import functools

import jax
import jax.numpy as jnp
from jax.experimental import pallas as pl
from jax.experimental.pallas import tpu as pltpu


def _round_up(n, m):
    return ((n + m - 1) // m) * m


# ------------------------------ kernel ------------------------------------

def actor_kernel(x_ref, w1_ref, b1_ref, w2_ref, b2_ref, out_ref, *, discrete):
    # x arrives as f32; cast to bf16 in-kernel for the MXU (f32 accumulation).
    x_bf = x_ref[...].astype(jnp.bfloat16)

    # fc1 + relu
    h = jnp.dot(x_bf, w1_ref[...],
                preferred_element_type=jnp.float32) + b1_ref[...]
    h = jnp.maximum(h, 0.0)

    # fc2: W2 is zero-padded to 128 lanes. For the discrete head the padded b2
    # lanes hold -1e30, so padded logits are exactly -1e30 -> exp() == 0 and no
    # per-tile iota/where mask is needed.
    logits = jnp.dot(h.astype(jnp.bfloat16), w2_ref[...],
                     preferred_element_type=jnp.float32) + b2_ref[...]

    if discrete:
        m = jnp.max(logits, axis=-1, keepdims=True)
        e = jnp.exp(logits - m)
        denom = jnp.sum(e, axis=-1, keepdims=True)
        out_ref[...] = (e / denom).astype(out_ref.dtype)   # exact: rows sum to 1
    else:
        out_ref[...] = jnp.tanh(logits).astype(out_ref.dtype)


# ------------------------------ wrappers -----------------------------------

def prepare_actor_params(w1, b1, w2, b2, *, discrete=True):
    """One-time weight preprocessing (pad to 128 lanes, bf16 casts).

    Do this at parameter creation time, not on every forward call.
    """
    obs_dim, hid = w1.shape
    hid2, ac_dim = w2.shape
    assert hid == hid2
    ac_pad = _round_up(max(ac_dim, 128), 128)

    w1_bf = w1.astype(jnp.bfloat16)
    b1_r = b1.reshape(1, hid).astype(jnp.float32)

    w2_p = jnp.zeros((hid, ac_pad), jnp.bfloat16).at[:, :ac_dim].set(
        w2.astype(jnp.bfloat16))
    # Discrete: bake the lane mask into the bias (padded lanes = -1e30).
    # Continuous: padded lanes stay 0 -> tanh(0) = 0, dropped by the slice.
    pad_fill = -1e30 if discrete else 0.0
    b2_p = jnp.full((1, ac_pad), pad_fill, jnp.float32).at[0, :ac_dim].set(
        b2.astype(jnp.float32))

    return dict(w1=w1_bf, b1=b1_r, w2=w2_p, b2=b2_p,
                obs_dim=obs_dim, hid=hid, ac_dim=ac_dim, ac_pad=ac_pad,
                discrete=discrete)


def actor_forward(x, params, *, out_dtype=jnp.float32, trim_output=True):
    """x: [B, obs_dim] float32. Returns [B, ac_dim] (trim_output=True, default)
    or the padded lane-dense [B, ac_pad] slab (trim_output=False, fast path)."""
    B, obs_dim = x.shape
    assert obs_dim == params["obs_dim"]
    hid = params["hid"]
    ac_dim = params["ac_dim"]
    ac_pad = params["ac_pad"]
    discrete = params["discrete"]

    # Large batch tile (per-grid-step overhead & HBM bound), multiple of 16,
    # and >= 2 grid steps when possible so v7x's two TensorCores both get work.
    TB = min(2048, max(16, _round_up(pl.cdiv(B, 2), 16)))
    grid = (pl.cdiv(B, TB),)   # ragged last block handled by Pallas, no concat pad

    kernel = functools.partial(actor_kernel, discrete=discrete)

    out_pad = pl.pallas_call(
        kernel,
        out_shape=jax.ShapeDtypeStruct((B, ac_pad), out_dtype),
        grid=grid,
        in_specs=[
            pl.BlockSpec((TB, obs_dim), lambda i: (i, 0)),    # streamed f32 tiles
            pl.BlockSpec((obs_dim, hid), lambda i: (0, 0)),   # VMEM-resident
            pl.BlockSpec((1, hid), lambda i: (0, 0)),         # VMEM-resident
            pl.BlockSpec((hid, ac_pad), lambda i: (0, 0)),    # VMEM-resident
            pl.BlockSpec((1, ac_pad), lambda i: (0, 0)),      # VMEM-resident
        ],
        out_specs=pl.BlockSpec((TB, ac_pad), lambda i: (i, 0)),
        compiler_params=pltpu.CompilerParams(
            dimension_semantics=("parallel",),   # megacore-shardable batch axis
            vmem_limit_bytes=32 * 1024 * 1024,   # safe on v5e/v6e/v7x
        ),
    )(x, params["w1"], params["b1"], params["w2"], params["b2"])

    if trim_output:
        return out_pad[:, :ac_dim]
    return out_pad


def _init_linear(key, fan_in, fan_out):
    # Deterministic init mimicking nn.Linear's U(-1/sqrt(fan_in), 1/sqrt(fan_in))
    kw, kb = jax.random.split(key)
    bound = 1.0 / jnp.sqrt(fan_in)
    w = jax.random.uniform(kw, (fan_in, fan_out), jnp.float32, -bound, bound)
    b = jax.random.uniform(kb, (fan_out,), jnp.float32, -bound, bound)
    return w, b


if __name__ == "__main__":
    # Shapes consistent with the module: obs_dim=32, hidden=64 (fixed), ac_dim=8
    B, OBS_DIM, HID, AC_DIM = 2, 32, 64, 8

    key = jax.random.PRNGKey(0)
    kx, k1, k2 = jax.random.split(key, 3)

    x = jax.random.normal(kx, (B, OBS_DIM), jnp.float32)
    w1, b1 = _init_linear(k1, OBS_DIM, HID)
    w2, b2 = _init_linear(k2, HID, AC_DIM)

    # ---- reference in plain JAX (same bf16-operand / f32-accumulate recipe) ----
    h_ref = jnp.maximum(
        jnp.dot(x.astype(jnp.bfloat16), w1.astype(jnp.bfloat16),
                preferred_element_type=jnp.float32) + b1, 0.0)
    logits_ref = jnp.dot(h_ref.astype(jnp.bfloat16), w2.astype(jnp.bfloat16),
                         preferred_element_type=jnp.float32) + b2

    # Discrete head (softmax over actions)
    params_d = prepare_actor_params(w1, b1, w2, b2, discrete=True)
    out = jax.block_until_ready(actor_forward(x, params_d))
    ref = jax.nn.softmax(logits_ref, axis=1)
    assert out.shape == (B, AC_DIM)
    assert jnp.allclose(out, ref, atol=2e-3, rtol=2e-3), "mismatch (softmax)"

    # Continuous head (tanh) — same kernel, different epilogue / bias padding
    params_c = prepare_actor_params(w1, b1, w2, b2, discrete=False)
    out_c = jax.block_until_ready(actor_forward(x, params_c))
    ref_c = jnp.tanh(logits_ref)
    assert out_c.shape == (B, AC_DIM)
    assert jnp.allclose(out_c, ref_c, atol=1e-3, rtol=1e-3), "mismatch (tanh)"

    # Fast output path from the perf review: bf16, padded lane-dense slab,
    # no post-kernel slice copy. Valid lanes must still match within bf16 tol.
    out_fast = jax.block_until_ready(
        actor_forward(x, params_d, out_dtype=jnp.bfloat16, trim_output=False))
    assert out_fast.shape == (B, params_d["ac_pad"])
    assert jnp.allclose(out_fast[:, :AC_DIM].astype(jnp.float32), ref,
                        atol=1e-2, rtol=2e-2), "mismatch (bf16 fast path)"

    # TODO(synk): Actor.act (Categorical/Normal sampling + log_prob) is
    # distribution-sampling glue; it could be fused in-kernel with
    # pltpu.prng_seed/prng_random_bits for large-batch inference, but is left
    # outside the kernel here.
    print("KERNEL_OK")
</pallas_src>

<mosaic_0001>
module attributes {stable_mosaic.version = 11 : i64} {
  func.func @actor_kernel(%arg0: i32, %arg1: memref<16x32xf32, #tpu.memory_space<vmem>>, %arg2: memref<32x64xbf16, #tpu.memory_space<vmem>>, %arg3: memref<1x64xf32, #tpu.memory_space<vmem>>, %arg4: memref<64x128xbf16, #tpu.memory_space<vmem>>, %arg5: memref<1x128xf32, #tpu.memory_space<vmem>>, %arg6: memref<16x128xf32, #tpu.memory_space<vmem>>) attributes {dimension_semantics = [#tpu.dimension_semantics<parallel>], iteration_bounds = array<i64: 1>, scalar_prefetch = 0 : i64, scratch_operands = 0 : i64, tpu.core_type = #tpu.core_type<tc>, window_params = [{transform_indices = @transform_0, window_bounds = array<i64: 16, 32>}, {pipeline_mode = #tpu.pipeline_mode<synchronous>, transform_indices = @transform_1, window_bounds = array<i64: 32, 64>}, {pipeline_mode = #tpu.pipeline_mode<synchronous>, transform_indices = @transform_2, window_bounds = array<i64: 1, 64>}, {pipeline_mode = #tpu.pipeline_mode<synchronous>, transform_indices = @transform_3, window_bounds = array<i64: 64, 128>}, {pipeline_mode = #tpu.pipeline_mode<synchronous>, transform_indices = @transform_4, window_bounds = array<i64: 1, 128>}, {transform_indices = @transform_5, window_bounds = array<i64: 16, 128>}]} {
    %c0 = arith.constant 0 : index
    %c0_0 = arith.constant 0 : index
    %0 = vector.load %arg1[%c0, %c0_0] : memref<16x32xf32, #tpu.memory_space<vmem>>, vector<16x32xf32>
    %1 = arith.truncf %0 : vector<16x32xf32> to vector<16x32xbf16>
    %c0_1 = arith.constant 0 : index
    %c0_2 = arith.constant 0 : index
    %2 = vector.load %arg2[%c0_1, %c0_2] : memref<32x64xbf16, #tpu.memory_space<vmem>>, vector<32x64xbf16>
    %cst = arith.constant dense<0.000000e+00> : vector<16x64xf32>
    %3 = tpu.matmul %1, %2, %cst {dimension_numbers = #tpu.dot_dimension_numbers<[1], [0], [0], [1], [0, 0, 1, 1], [], []>} : vector<16x32xbf16>, vector<32x64xbf16>, vector<16x64xf32> -> vector<16x64xf32>
    %c0_3 = arith.constant 0 : index
    %c0_4 = arith.constant 0 : index
    %4 = vector.load %arg3[%c0_3, %c0_4] : memref<1x64xf32, #tpu.memory_space<vmem>>, vector<1x64xf32>
    %5 = vector.broadcast %4 : vector<1x64xf32> to vector<16x64xf32>
    %6 = arith.addf %3, %5 : vector<16x64xf32>
    %cst_5 = arith.constant 0.000000e+00 : f32
    %7 = vector.broadcast %cst_5 : f32 to vector<16x64xf32>
    %8 = arith.maximumf %6, %7 : vector<16x64xf32>
    %9 = arith.truncf %8 : vector<16x64xf32> to vector<16x64xbf16>
    %c0_6 = arith.constant 0 : index
    %c0_7 = arith.constant 0 : index
    %10 = vector.load %arg4[%c0_6, %c0_7] : memref<64x128xbf16, #tpu.memory_space<vmem>>, vector<64x128xbf16>
    %cst_8 = arith.constant dense<0.000000e+00> : vector<16x128xf32>
    %11 = tpu.matmul %9, %10, %cst_8 {dimension_numbers = #tpu.dot_dimension_numbers<[1], [0], [0], [1], [0, 0, 1, 1], [], []>} : vector<16x64xbf16>, vector<64x128xbf16>, vector<16x128xf32> -> vector<16x128xf32>
    %c0_9 = arith.constant 0 : index
    %c0_10 = arith.constant 0 : index
    %12 = vector.load %arg5[%c0_9, %c0_10] : memref<1x128xf32, #tpu.memory_space<vmem>>, vector<1x128xf32>
    %13 = vector.broadcast %12 : vector<1x128xf32> to vector<16x128xf32>
    %14 = arith.addf %11, %13 : vector<16x128xf32>
    %cst_11 = arith.constant dense<0xFF800000> : vector<16xf32>
    %15 = vector.multi_reduction <maximumf>, %14, %cst_11 [1] : vector<16x128xf32> to vector<16xf32>
    %16 = vector.shape_cast %15 : vector<16xf32> to vector<16x1xf32>
    %17 = vector.broadcast %16 : vector<16x1xf32> to vector<16x128xf32>
    %18 = arith.subf %14, %17 : vector<16x128xf32>
    %19 = math.exp %18 : vector<16x128xf32>
    %cst_12 = arith.constant dense<0.000000e+00> : vector<16xf32>
    %20 = vector.multi_reduction <add>, %19, %cst_12 [1] : vector<16x128xf32> to vector<16xf32>
    %21 = vector.shape_cast %20 : vector<16xf32> to vector<16x1xf32>
    %22 = vector.broadcast %21 : vector<16x1xf32> to vector<16x128xf32>
    %23 = arith.divf %19, %22 : vector<16x128xf32>
    %c0_13 = arith.constant 0 : index
    %c0_14 = arith.constant 0 : index
    %24 = vector.load %arg6[%c0_13, %c0_14] : memref<16x128xf32, #tpu.memory_space<vmem>>, vector<16x128xf32>
    tpu.vector_store %arg6[%c0_13, %c0_14], %23 {strides = array<i32>} : memref<16x128xf32, #tpu.memory_space<vmem>>, vector<16x128xf32>,
    return
  }
  func.func @transform_0(%arg0: i32) -> (i32, i32) {
    %c0_i32 = arith.constant 0 : i32
    %c0_i32_0 = arith.constant 0 : i32
    return %arg0, %c0_i32 : i32, i32
  }
  func.func @transform_1(%arg0: i32) -> (i32, i32) {
    %c0_i32 = arith.constant 0 : i32
    %c0_i32_0 = arith.constant 0 : i32
    %c0_i32_1 = arith.constant 0 : i32
    return %c0_i32, %c0_i32_0 : i32, i32
  }
  func.func @transform_2(%arg0: i32) -> (i32, i32) {
    %c0_i32 = arith.constant 0 : i32
    %c0_i32_0 = arith.constant 0 : i32
    %c0_i32_1 = arith.constant 0 : i32
    return %c0_i32, %c0_i32_0 : i32, i32
  }
  func.func @transform_3(%arg0: i32) -> (i32, i32) {
    %c0_i32 = arith.constant 0 : i32
    %c0_i32_0 = arith.constant 0 : i32
    %c0_i32_1 = arith.constant 0 : i32
    return %c0_i32, %c0_i32_0 : i32, i32
  }
  func.func @transform_4(%arg0: i32) -> (i32, i32) {
    %c0_i32 = arith.constant 0 : i32
    %c0_i32_0 = arith.constant 0 : i32
    %c0_i32_1 = arith.constant 0 : i32
    return %c0_i32, %c0_i32_0 : i32, i32
  }
  func.func @transform_5(%arg0: i32) -> (i32, i32) {
    %c0_i32 = arith.constant 0 : i32
    %c0_i32_0 = arith.constant 0 : i32
    return %arg0, %c0_i32 : i32, i32
  }
}

</mosaic_0001>

<bundles_post_ra>
// kernel: tpu_custom_call.1
= control target key start
LH: loop header
LB: loop body
LE: loop exit
PB: predicated region body
PF: predicated region fallthrough
CT: control target
= control target key end

     0   :  { %10 = vsyncpa [#allocation3], 0  ;;  %s477_s0 = inlined_call_operand.hbm [shape: f32[2,32], index: 0, kind: input, shape index: {}]   ;;  %s478_s1 = inlined_call_operand.hbm [shape: bf16[32,64], index: 1, kind: input, shape index: {}]   ;;  %s479_s2 = inlined_call_operand.vmem [shape: f32[1,64], index: 2, kind: input, shape index: {}]   ;;  %s480_s3 = inlined_call_operand.hbm [shape: bf16[64,128], index: 3, kind: input, shape index: {}]   ;;  %s481_s4 = inlined_call_operand.vmem [shape: f32[1,128], index: 4, kind: input, shape index: {}]   ;;  %s482_s5 = inlined_call_operand.hbm [shape: f32[2,128], index: 5, kind: output, shape index: {}]  }
   0x1   :  { %11 = vsyncpa [#allocation6], 0 }
   0x2   :  { %12 = vsyncpa [#allocation4], 0 }
   0x3   :  { %17 = vsyncadd [#allocation3], 224  ;;  %s407_s18 = smov [#allocation5]  }
   0x4   :  { %s30_s19 = sshll.u32 %s407_s18, 4  ;;  %s31_s19 = int_to_ptr.vmem [resolvable:$true] %s30_s19 }
   0x5   :  { %s329_s20 = scalar_lea.vmem %s31_s19, 256  ;;  %p334_p1 = scmp.lt.s32.totalorder %s31_s19, %s31_s19 }
   0x6   :  { %p330_p0 = scmp.ne.s32.totalorder %s31_s19, %s329_s20  ;;  %p335_p2 = scmp.lt.s32.totalorder %s329_s20, %s329_s20 }
   0x8   :  { %p336_p3 = por %p335_p2, %p334_p1 }
   0xa   :  { %p337_p4 = pnand %p336_p3, %p330_p0 }
   0xc   :  { %340 = shalt.err (!%p337_p4)
}
   0xd   :  { %s408_s21 = smov 64   ;;  %s409_s22 = smov 4  }
   0xe   :  { %36 = dma.hbm_to_vmem [thread:$0]  %s478_s1, 256, %s31_s19, [#allocation6], %s408_s21, %s408_s21, %s409_s22  }
   0xf   :  { %s410_s25 = smov [#allocation2]  }
  0x10   :  { %s18_s26 = sshll.u32 %s410_s25, 4  ;;  %s19_s26 = int_to_ptr.vmem [resolvable:$true] %s18_s26 }
  0x11   :  { %s349_s27 = scalar_lea.vmem %s19_s26, 32  ;;  %s353_s28 = scalar_lea.vmem %s19_s26, 256 }
  0x12   :  { %p350_p5 = scmp.ne.s32.totalorder %s19_s26, %s349_s27  ;;  %p354_p6 = scmp.lt.s32.totalorder %s19_s26, %s19_s26 }
  0x13   :  { %p355_p7 = scmp.lt.s32.totalorder %s353_s28, %s349_s27 }
  0x15   :  { %p356_p8 = por %p355_p7, %p354_p6 }
  0x17   :  { %p357_p9 = pnand %p356_p8, %p350_p5 }
  0x19   :  { %360 = shalt.err (!%p357_p9)
}
  0x1a   :  { %s411_s29 = smov 32   ;;  %s412_s30 = smov 2  }
  0x1b   :  { %24 = dma.hbm_to_vmem [thread:$0]  %s477_s0, 32, %s19_s26, [#allocation3], %s411_s29, %s411_s29, %s412_s30  }
  0x1c   :  { %s413_s1 = smov [#allocation7]  }
  0x1d   :  { %s44_s8 = sshll.u32 %s413_s1, 4  ;;  %s45_s8 = int_to_ptr.vmem [resolvable:$true] %s44_s8 }
  0x1e   :  { %s369_s9 = scalar_lea.vmem %s45_s8, 512  ;;  %p374_p11 = scmp.lt.s32.totalorder %s45_s8, %s45_s8 }
  0x1f   :  { %p370_p10 = scmp.ne.s32.totalorder %s45_s8, %s369_s9  ;;  %p375_p12 = scmp.lt.s32.totalorder %s369_s9, %s369_s9 }
  0x21   :  { %p376_p13 = por %p375_p12, %p374_p11 }
  0x23   :  { %p377_p0 = pnand %p376_p13, %p370_p10 }
  0x25   :  { %380 = shalt.err (!%p377_p0)
}
  0x26   :  { %50 = dma.hbm_to_vmem [thread:$0]  %s480_s3, 512, %s45_s8, [#allocation6], %s408_s21, %s408_s21, %s409_s22  }
  0x27   :  { %401 = dma.done.wait [#allocation3], 256  }
  0x28   :  { %402 = vsyncadd [#allocation3], 4294967040 }
  0x29   :  { %403 = dma.done.wait [#allocation6], 768  }
  0x2a   :  { %404 = vsyncadd [#allocation6], 4294966528  ;;  %v414_v0 = vmov 0.0   ;;  %vm415_vm0 = vmmov 0   ;;  %v307_v1 = vld [vmem:[#allocation5 + $0x8] sm:$0xff]   ;;  %v308_v2 = vld [vmem:[#allocation5] sm:$0xff]  }
  0x2b   :  { %277 = vmatprep.subr.bf16.mxu0 %v414_v0  ;;  %281 = vmatprep.mubr.msk.bf16.mxu0 %vm415_vm0, %v414_v0  ;;  %v63_v3 = vld [vmem:[#allocation2] sm:$0xff]  ;;  %v64_v4 = vld [vmem:[#allocation2 + $0x8] sm:$0xff]  ;;  %v309_v5 = vld [vmem:[#allocation7 + $0x18] sm:$0xff]   ;;  %vm89_vm1 = vcmask 261120   ;;  %vm176_vm2 = vcmask 523264  }
  0x2c   :  { %285 = vmatprep.subr.bf16.mxu1 %v414_v0  ;;  %293 = vmatprep.mubr.msk.bf16.mxu1 %vm415_vm0, %v414_v0  ;;  %v65_v6 = vpack.c.bf16 %v64_v4, %v63_v3  ;;  %v310_v7 = vld [vmem:[#allocation7 + $0x10] sm:$0xff]   ;;  %v311_v8 = vld [vmem:[#allocation7 + $0x8] sm:$0xff]   ;;  %v312_v9 = vld [vmem:[#allocation7] sm:$0xff]  }
  0x2d   :  { %278 = vmatpush3.bf16.msra.mxu0 %v307_v1  ;;  %286 = vmatpush3.bf16.msra.mxu1 %v309_v5  ;;  %v259_v10 = vld [vmem:[%s479_s2] ss:$0 sm:$0xff] }
  0x2e   :  { %279 = vmatprep.subr.bf16.mxu0 %v414_v0  ;;  %287 = vmatprep.subr.bf16.mxu1 %v414_v0  ;;  %v263_v20 = vld [vmem:[%s481_s4] ss:$0 sm:$0xff] }
  0x31   :  { %280 = vmatpush3.bf16.msra.mxu0 %v308_v2  ;;  %288 = vmatpush3.bf16.msra.mxu1 %v310_v7 }
  0x32   :  { %289 = vmatprep.subr.bf16.mxu1 %v414_v0 }
  0x34   :  { %282 = vmatmul.mubr.msk.bf16.vlgmr.msra.gmra.mxu0 %vm89_vm1, %v65_v6 }
  0x35   :  { %290 = vmatpush3.bf16.msra.mxu1 %v311_v8 }
  0x36   :  { %291 = vmatprep.subr.bf16.mxu1 %v414_v0 }
  0x39   :  { %292 = vmatpush3.bf16.msra.mxu1 %v312_v9 }
  0xf4   :  { %v127_v11 = vpop.f32.mrf.mxu0 }
  0xf5   :  { %v128_v13 = vadd.f32 %v259_v10, %v127_v11 }
  0xf6   :  { %v283_v12 = vpop.f32.mrf.mxu0 }
  0xf7   :  { %v134_v17 = vmax.f32 %v128_v13, 0.0 }
  0xf8   :  { %v130_v14 = vpop.f32.mrf.mxu0 }
  0xf9   :  { %v131_v15 = vadd.f32 %v259_v10, %v130_v14 }
  0xfa   :  { %v284_v16 = vpop.f32.mrf.mxu0 }
  0xfb   :  { %v135_v18 = vmax.f32 %v131_v15, 0.0 }
  0xfd   :  { %v136_v19 = vpack.c.bf16 %v135_v18, %v134_v17 }
  0xff   :  { %294 = vmatmul.mubr.msk.bf16.vlgmr.msra.gmra.mxu1 %vm176_vm2, %v136_v19 }
 0x1bf   :  { %v214_v21 = vpop.f32.mrf.mxu1 }
 0x1c0   :  { %v215_v22 = vadd.f32 %v263_v20, %v214_v21 }
 0x1c1   :  { %v295_v23 = vpop.f32.mrf.mxu1 }
 0x1c2   :  { %221 = vmax.xlane.f32.xlu0 %v215_v22 }
 0x1c3   :  { %v217_v24 = vpop.f32.mrf.mxu1 }
 0x1c4   :  { %v218_v25 = vadd.f32 %v263_v20, %v217_v24 }
 0x1c5   :  { %v296_v26 = vpop.f32.mrf.mxu1 }
 0x1c6   :  { %223 = vmax.xlane.f32.xlu0 %v218_v25 }
 0x24b   :  { %v222_v27 = vpop.xlane.xlu0 %221 }
 0x24c   :  { %v225_v28 = vsub.f32 %v215_v22, %v222_v27 }
 0x24e   :  { %v227_v29 = vmul.f32 1.442695, %v225_v28 }
 0x24f   :  { %v224_v30 = vpop.xlane.xlu0 %223 }
 0x250   :  { %313 = vpow2.f32 %v227_v29  ;;  %v226_v31 = vsub.f32 %v218_v25, %v224_v30 }
 0x252   :  { %v229_v32 = vmul.f32 1.442695, %v226_v31 }
 0x254   :  { %315 = vpow2.f32 %v229_v32 }
 0x25d   :  { %v314_v33 = vpop.eup %313 }
 0x25e   :  { %231 = vadd.xlane.f32.xlu1 %v314_v33 }
 0x261   :  { %v316_v34 = vpop.eup %315 }
 0x262   :  { %233 = vadd.xlane.f32.xlu1 %v316_v34 }
 0x2e7   :  { %v232_v35 = vpop.xlane.xlu1 %231 }
 0x2e8   :  { %317 = vrcp.f32 %v232_v35 }
 0x2eb   :  { %v234_v36 = vpop.xlane.xlu1 %233 }
 0x2ec   :  { %319 = vrcp.f32 %v234_v36 }
 0x2f5   :  { %v318_v37 = vpop.eup %317 }
 0x2f6   :  { %v236_v38 = vmul.f32 %v318_v37, %v314_v33 }
 0x2f8   :  { %239 = vst [vmem:[#allocation8] sm:$0xff] %v236_v38 }
 0x2f9   :  { %v320_v39 = vpop.eup %319 }
 0x2fa   :  { %v238_v40 = vmul.f32 %v320_v39, %v316_v34 }
 0x2fc   :  { %240 = vst [vmem:[#allocation8 + $0x8] sm:$0xff] %v238_v40 }
 0x2fd   :  { %245 = vsyncadd [#allocation4], 224  ;;  %s416_s2 = smov [#allocation8]  }
 0x2fe   :  { %s246_s4 = sshll.u32 %s416_s2, 4  ;;  %s247_s4 = int_to_ptr.vmem [resolvable:$true] %s246_s4 }
 0x2ff   :  { %s381_s14 = scalar_lea.vmem %s247_s4, 32  ;;  %s385_s15 = scalar_lea.vmem %s247_s4, 256 }
 0x300   :  { %p382_p1 = scmp.ne.s32.totalorder %s247_s4, %s381_s14  ;;  %p386_p2 = scmp.lt.s32.totalorder %s247_s4, %s247_s4 }
 0x301   :  { %p387_p3 = scmp.lt.s32.totalorder %s385_s15, %s381_s14 }
 0x303   :  { %p388_p4 = por %p387_p3, %p386_p2 }
 0x305   :  { %p389_p5 = pnand %p388_p4, %p382_p1 }
 0x307   :  { %392 = shalt.err (!%p389_p5)
}
 0x308   :  { %252 = dma.vmem_to_hbm [thread:$0]  %s247_s4, 32, %s482_s5, [#allocation4], %s411_s29, %s411_s29, %s412_s30  }
 0x309   :  { %405 = dma.done.wait [#allocation4], 256  }
 0x30a   :  { %406 = vsyncadd [#allocation4], 4294967040 }
 0x30b   :  { %256 = vsyncpa [#allocation3], 1 }
 0x30c   :  { %257 = vsyncpa [#allocation6], 1 }
 0x30d   :  { %258 = vsyncpa [#allocation4], 1 }

</bundles_post_ra>
